<compile_context>
chip_gen: v7x
topology: tpu7x:2x2x1
jax: 0.10.0
libtpu: 0.0.40
codegen_flags: <defaults>
</compile_context>

<pallas_src>
import jax
import jax.numpy as jnp
from jax.experimental import pallas as pl
from jax.experimental.pallas import tpu as pltpu

IN_DIM = 32 * 32 * 3   # 3072
H1, H2, H3 = 64, 128, 64
OUT_DIM = 10           # len(CLASSES)


def mlp_kernel(x_ref, w1_ref, b1_ref, w2_ref, b2_ref,
               w3_ref, b3_ref, w4_ref, b4_ref, o_ref):
    # x arrives as f32 (single HBM read); cast to bf16 in-VMEM (VPU slack).
    x = x_ref[...].astype(jnp.bfloat16)

    h = jnp.dot(x, w1_ref[...], preferred_element_type=jnp.float32) + b1_ref[...]
    h = jnp.maximum(h, 0.0)

    h = jnp.dot(h.astype(jnp.bfloat16), w2_ref[...],
                preferred_element_type=jnp.float32) + b2_ref[...]
    h = jnp.maximum(h, 0.0)

    h = jnp.dot(h.astype(jnp.bfloat16), w3_ref[...],
                preferred_element_type=jnp.float32) + b3_ref[...]
    h = jnp.maximum(h, 0.0)

    h = jnp.dot(h.astype(jnp.bfloat16), w4_ref[...],
                preferred_element_type=jnp.float32) + b4_ref[...]

    o_ref[...] = h.astype(o_ref.dtype)


def _choose_batch_tile(B, tm):
    """Pick a sublane-aligned batch tile; >=2 tiles when B >= 16 (megacore)."""
    tm = max(8, (tm // 8) * 8)
    if B < 16:
        # Single block spanning the whole (tiny) batch: block dim == full dim,
        # which satisfies the (8,128) BlockSpec rule without padding.
        return B
    half = (B + 1) // 2
    half_aligned = ((half + 7) // 8) * 8
    return min(tm, half_aligned)


def neural_network_forward(x, params, *, tm=512):
    """x: (B, 3, 32, 32) float32 (NCHW, like PyTorch). Returns (B, 10) f32."""
    B = x.shape[0]
    # == x.view(-1, 32*32*3); keep f32 (cast to bf16 happens inside the kernel)
    x_flat = x.reshape(B, IN_DIM).astype(jnp.float32)

    tm_eff = _choose_batch_tile(B, tm)
    grid = (pl.cdiv(B, tm_eff),)   # last block may be partial (OOB rows masked)

    (w1, b1), (w2, b2), (w3, b3), (w4, b4) = params
    weights = [w.astype(jnp.bfloat16) for w in (w1, w2, w3, w4)]
    biases = [b.reshape(1, -1).astype(jnp.float32) for b in (b1, b2, b3, b4)]

    # x tile walks the batch; weights/biases are VMEM-resident (constant block
    # index, single buffer -> fetched from HBM exactly once).
    in_specs = [pl.BlockSpec((tm_eff, IN_DIM), lambda i: (i, 0))]
    args = [x_flat]
    for w, b in zip(weights, biases):
        in_specs.append(pl.BlockSpec(w.shape, lambda i: (0, 0),
                                     pipeline_mode=pl.Buffered(1)))
        in_specs.append(pl.BlockSpec(b.shape, lambda i: (0, 0),
                                     pipeline_mode=pl.Buffered(1)))
        args.append(w)
        args.append(b)

    flops = 2 * B * (IN_DIM * H1 + H1 * H2 + H2 * H3 + H3 * OUT_DIM)
    bytes_accessed = (x_flat.size * 4                       # f32 x read
                      + sum(w.size * 2 for w in weights)    # bf16 weights
                      + sum(b.size * 4 for b in biases)
                      + B * OUT_DIM * 4)                    # f32 output

    # Double-buffered f32 x tiles dominate VMEM; add headroom for weights,
    # activations and the output buffers.  Stays under v7x's 64 MiB physical.
    vmem_limit_bytes = int(min(2 * tm_eff * IN_DIM * 4 + (16 << 20), 56 << 20))

    out = pl.pallas_call(
        mlp_kernel,
        out_shape=jax.ShapeDtypeStruct((B, OUT_DIM), jnp.float32),
        grid=grid,
        in_specs=in_specs,
        out_specs=pl.BlockSpec((tm_eff, OUT_DIM), lambda i: (i, 0)),
        compiler_params=pltpu.CompilerParams(
            dimension_semantics=("parallel",),
            vmem_limit_bytes=vmem_limit_bytes),
        cost_estimate=pl.CostEstimate(
            flops=flops, transcendentals=0, bytes_accessed=bytes_accessed),
    )(*args)
    return out


def init_params(key):
    """Deterministic init mirroring nn.Linear default (U[-1/sqrt(fan_in), +])."""
    dims = [(IN_DIM, H1), (H1, H2), (H2, H3), (H3, OUT_DIM)]
    params = []
    for (fan_in, fan_out) in dims:
        key, kw, kb = jax.random.split(key, 3)
        bound = 1.0 / jnp.sqrt(fan_in)
        w = jax.random.uniform(kw, (fan_in, fan_out), jnp.float32, -bound, bound)
        b = jax.random.uniform(kb, (fan_out,), jnp.float32, -bound, bound)
        params.append((w, b))
    return params


if __name__ == "__main__":
    key = jax.random.PRNGKey(0)
    key, kx = jax.random.split(key)

    B = 2
    x = jax.random.normal(kx, (B, 3, 32, 32), jnp.float32)  # NCHW like PyTorch
    params = init_params(key)

    out = neural_network_forward(x, params)
    jax.block_until_ready(out)
    assert out.shape == (B, OUT_DIM)

    # Reference in plain JAX with the SAME bf16-input / f32-accum math.
    h = x.reshape(B, -1).astype(jnp.bfloat16)
    for i, (w, b) in enumerate(params):
        h = jnp.dot(h, w.astype(jnp.bfloat16),
                    preferred_element_type=jnp.float32) + b
        if i < 3:
            h = jnp.maximum(h, 0.0).astype(jnp.bfloat16)
    assert jnp.allclose(out, h, atol=1e-2, rtol=1e-2), "mismatch vs reference"

    print("KERNEL_OK")
</pallas_src>

<mosaic_0001>
module attributes {stable_mosaic.version = 11 : i64} {
  func.func @mlp_kernel(%arg0: i32, %arg1: memref<2x3072xf32, #tpu.memory_space<vmem>>, %arg2: memref<3072x64xbf16, #tpu.memory_space<vmem>>, %arg3: memref<1x64xf32, #tpu.memory_space<vmem>>, %arg4: memref<64x128xbf16, #tpu.memory_space<vmem>>, %arg5: memref<1x128xf32, #tpu.memory_space<vmem>>, %arg6: memref<128x64xbf16, #tpu.memory_space<vmem>>, %arg7: memref<1x64xf32, #tpu.memory_space<vmem>>, %arg8: memref<64x10xbf16, #tpu.memory_space<vmem>>, %arg9: memref<1x10xf32, #tpu.memory_space<vmem>>, %arg10: memref<2x10xf32, #tpu.memory_space<vmem>>) attributes {dimension_semantics = [#tpu.dimension_semantics<parallel>], iteration_bounds = array<i64: 1>, scalar_prefetch = 0 : i64, scratch_operands = 0 : i64, tpu.core_type = #tpu.core_type<tc>, window_params = [{transform_indices = @transform_0, window_bounds = array<i64: 2, 3072>}, {pipeline_mode = #tpu.pipeline_mode<synchronous>, transform_indices = @transform_1, window_bounds = array<i64: 3072, 64>}, {pipeline_mode = #tpu.pipeline_mode<synchronous>, transform_indices = @transform_2, window_bounds = array<i64: 1, 64>}, {pipeline_mode = #tpu.pipeline_mode<synchronous>, transform_indices = @transform_3, window_bounds = array<i64: 64, 128>}, {pipeline_mode = #tpu.pipeline_mode<synchronous>, transform_indices = @transform_4, window_bounds = array<i64: 1, 128>}, {pipeline_mode = #tpu.pipeline_mode<synchronous>, transform_indices = @transform_5, window_bounds = array<i64: 128, 64>}, {pipeline_mode = #tpu.pipeline_mode<synchronous>, transform_indices = @transform_6, window_bounds = array<i64: 1, 64>}, {pipeline_mode = #tpu.pipeline_mode<synchronous>, transform_indices = @transform_7, window_bounds = array<i64: 64, 10>}, {pipeline_mode = #tpu.pipeline_mode<synchronous>, transform_indices = @transform_8, window_bounds = array<i64: 1, 10>}, {transform_indices = @transform_9, window_bounds = array<i64: 2, 10>}]} {
    %c0 = arith.constant 0 : index
    %c0_0 = arith.constant 0 : index
    %0 = vector.load %arg1[%c0, %c0_0] : memref<2x3072xf32, #tpu.memory_space<vmem>>, vector<2x3072xf32>
    %1 = arith.truncf %0 : vector<2x3072xf32> to vector<2x3072xbf16>
    %c0_1 = arith.constant 0 : index
    %c0_2 = arith.constant 0 : index
    %2 = vector.load %arg2[%c0_1, %c0_2] : memref<3072x64xbf16, #tpu.memory_space<vmem>>, vector<3072x64xbf16>
    %cst = arith.constant dense<0.000000e+00> : vector<2x64xf32>
    %3 = tpu.matmul %1, %2, %cst {dimension_numbers = #tpu.dot_dimension_numbers<[1], [0], [0], [1], [0, 0, 1, 1], [], []>} : vector<2x3072xbf16>, vector<3072x64xbf16>, vector<2x64xf32> -> vector<2x64xf32>
    %c0_3 = arith.constant 0 : index
    %c0_4 = arith.constant 0 : index
    %4 = vector.load %arg3[%c0_3, %c0_4] : memref<1x64xf32, #tpu.memory_space<vmem>>, vector<1x64xf32>
    %5 = vector.broadcast %4 : vector<1x64xf32> to vector<2x64xf32>
    %6 = arith.addf %3, %5 : vector<2x64xf32>
    %cst_5 = arith.constant 0.000000e+00 : f32
    %7 = vector.broadcast %cst_5 : f32 to vector<2x64xf32>
    %8 = arith.maximumf %6, %7 : vector<2x64xf32>
    %9 = arith.truncf %8 : vector<2x64xf32> to vector<2x64xbf16>
    %c0_6 = arith.constant 0 : index
    %c0_7 = arith.constant 0 : index
    %10 = vector.load %arg4[%c0_6, %c0_7] : memref<64x128xbf16, #tpu.memory_space<vmem>>, vector<64x128xbf16>
    %cst_8 = arith.constant dense<0.000000e+00> : vector<2x128xf32>
    %11 = tpu.matmul %9, %10, %cst_8 {dimension_numbers = #tpu.dot_dimension_numbers<[1], [0], [0], [1], [0, 0, 1, 1], [], []>} : vector<2x64xbf16>, vector<64x128xbf16>, vector<2x128xf32> -> vector<2x128xf32>
    %c0_9 = arith.constant 0 : index
    %c0_10 = arith.constant 0 : index
    %12 = vector.load %arg5[%c0_9, %c0_10] : memref<1x128xf32, #tpu.memory_space<vmem>>, vector<1x128xf32>
    %13 = vector.broadcast %12 : vector<1x128xf32> to vector<2x128xf32>
    %14 = arith.addf %11, %13 : vector<2x128xf32>
    %cst_11 = arith.constant 0.000000e+00 : f32
    %15 = vector.broadcast %cst_11 : f32 to vector<2x128xf32>
    %16 = arith.maximumf %14, %15 : vector<2x128xf32>
    %17 = arith.truncf %16 : vector<2x128xf32> to vector<2x128xbf16>
    %c0_12 = arith.constant 0 : index
    %c0_13 = arith.constant 0 : index
    %18 = vector.load %arg6[%c0_12, %c0_13] : memref<128x64xbf16, #tpu.memory_space<vmem>>, vector<128x64xbf16>
    %cst_14 = arith.constant dense<0.000000e+00> : vector<2x64xf32>
    %19 = tpu.matmul %17, %18, %cst_14 {dimension_numbers = #tpu.dot_dimension_numbers<[1], [0], [0], [1], [0, 0, 1, 1], [], []>} : vector<2x128xbf16>, vector<128x64xbf16>, vector<2x64xf32> -> vector<2x64xf32>
    %c0_15 = arith.constant 0 : index
    %c0_16 = arith.constant 0 : index
    %20 = vector.load %arg7[%c0_15, %c0_16] : memref<1x64xf32, #tpu.memory_space<vmem>>, vector<1x64xf32>
    %21 = vector.broadcast %20 : vector<1x64xf32> to vector<2x64xf32>
    %22 = arith.addf %19, %21 : vector<2x64xf32>
    %cst_17 = arith.constant 0.000000e+00 : f32
    %23 = vector.broadcast %cst_17 : f32 to vector<2x64xf32>
    %24 = arith.maximumf %22, %23 : vector<2x64xf32>
    %25 = arith.truncf %24 : vector<2x64xf32> to vector<2x64xbf16>
    %c0_18 = arith.constant 0 : index
    %c0_19 = arith.constant 0 : index
    %26 = vector.load %arg8[%c0_18, %c0_19] : memref<64x10xbf16, #tpu.memory_space<vmem>>, vector<64x10xbf16>
    %cst_20 = arith.constant dense<0.000000e+00> : vector<2x10xf32>
    %27 = tpu.matmul %25, %26, %cst_20 {dimension_numbers = #tpu.dot_dimension_numbers<[1], [0], [0], [1], [0, 0, 1, 1], [], []>} : vector<2x64xbf16>, vector<64x10xbf16>, vector<2x10xf32> -> vector<2x10xf32>
    %c0_21 = arith.constant 0 : index
    %c0_22 = arith.constant 0 : index
    %28 = vector.load %arg9[%c0_21, %c0_22] : memref<1x10xf32, #tpu.memory_space<vmem>>, vector<1x10xf32>
    %29 = vector.broadcast %28 : vector<1x10xf32> to vector<2x10xf32>
    %30 = arith.addf %27, %29 : vector<2x10xf32>
    %c0_23 = arith.constant 0 : index
    %c0_24 = arith.constant 0 : index
    %31 = vector.load %arg10[%c0_23, %c0_24] : memref<2x10xf32, #tpu.memory_space<vmem>>, vector<2x10xf32>
    tpu.vector_store %arg10[%c0_23, %c0_24], %30 {strides = array<i32>} : memref<2x10xf32, #tpu.memory_space<vmem>>, vector<2x10xf32>,
    return
  }
  func.func @transform_0(%arg0: i32) -> (i32, i32) {
    %c0_i32 = arith.constant 0 : i32
    %c0_i32_0 = arith.constant 0 : i32
    return %arg0, %c0_i32 : i32, i32
  }
  func.func @transform_1(%arg0: i32) -> (i32, i32) {
    %c0_i32 = arith.constant 0 : i32
    %c0_i32_0 = arith.constant 0 : i32
    %c0_i32_1 = arith.constant 0 : i32
    return %c0_i32, %c0_i32_0 : i32, i32
  }
  func.func @transform_2(%arg0: i32) -> (i32, i32) {
    %c0_i32 = arith.constant 0 : i32
    %c0_i32_0 = arith.constant 0 : i32
    %c0_i32_1 = arith.constant 0 : i32
    return %c0_i32, %c0_i32_0 : i32, i32
  }
  func.func @transform_3(%arg0: i32) -> (i32, i32) {
    %c0_i32 = arith.constant 0 : i32
    %c0_i32_0 = arith.constant 0 : i32
    %c0_i32_1 = arith.constant 0 : i32
    return %c0_i32, %c0_i32_0 : i32, i32
  }
  func.func @transform_4(%arg0: i32) -> (i32, i32) {
    %c0_i32 = arith.constant 0 : i32
    %c0_i32_0 = arith.constant 0 : i32
    %c0_i32_1 = arith.constant 0 : i32
    return %c0_i32, %c0_i32_0 : i32, i32
  }
  func.func @transform_5(%arg0: i32) -> (i32, i32) {
    %c0_i32 = arith.constant 0 : i32
    %c0_i32_0 = arith.constant 0 : i32
    %c0_i32_1 = arith.constant 0 : i32
    return %c0_i32, %c0_i32_0 : i32, i32
  }
  func.func @transform_6(%arg0: i32) -> (i32, i32) {
    %c0_i32 = arith.constant 0 : i32
    %c0_i32_0 = arith.constant 0 : i32
    %c0_i32_1 = arith.constant 0 : i32
    return %c0_i32, %c0_i32_0 : i32, i32
  }
  func.func @transform_7(%arg0: i32) -> (i32, i32) {
    %c0_i32 = arith.constant 0 : i32
    %c0_i32_0 = arith.constant 0 : i32
    %c0_i32_1 = arith.constant 0 : i32
    return %c0_i32, %c0_i32_0 : i32, i32
  }
  func.func @transform_8(%arg0: i32) -> (i32, i32) {
    %c0_i32 = arith.constant 0 : i32
    %c0_i32_0 = arith.constant 0 : i32
    %c0_i32_1 = arith.constant 0 : i32
    return %c0_i32, %c0_i32_0 : i32, i32
  }
  func.func @transform_9(%arg0: i32) -> (i32, i32) {
    %c0_i32 = arith.constant 0 : i32
    %c0_i32_0 = arith.constant 0 : i32
    return %arg0, %c0_i32 : i32, i32
  }
}

</mosaic_0001>

<bundles_post_ra>
// kernel: tpu_custom_call.1
= control target key start
LH: loop header
LB: loop body
LE: loop exit
PB: predicated region body
PF: predicated region fallthrough
CT: control target
= control target key end

     0   :  { %v50_v28 = vlaneseq  ;;  %v3300_v36 = vmov 1983009808   ;;  %s4058_s0 = inlined_call_operand.vmem [shape: f32[2,3072], index: 0, kind: input, shape index: {}]   ;;  %s4059_s1 = inlined_call_operand.vmem [shape: bf16[3072,64], index: 1, kind: input, shape index: {}]   ;;  %s4060_s2 = inlined_call_operand.vmem [shape: f32[1,64], index: 2, kind: input, shape index: {}]   ;;  %s4061_s3 = inlined_call_operand.vmem [shape: bf16[64,128], index: 3, kind: input, shape index: {}]   ;;  %s4062_s4 = inlined_call_operand.vmem [shape: f32[1,128], index: 4, kind: input, shape index: {}]   ;;  %s4063_s5 = inlined_call_operand.vmem [shape: bf16[128,64], index: 5, kind: input, shape index: {}]   ;;  %s4064_s6 = inlined_call_operand.vmem [shape: f32[1,64], index: 6, kind: input, shape index: {}]   ;;  %s4065_s7 = inlined_call_operand.vmem [shape: bf16[64,10], index: 7, kind: input, shape index: {}]   ;;  %s4066_s8 = inlined_call_operand.vmem [shape: f32[1,10], index: 8, kind: input, shape index: {}]   ;;  %s4067_s9 = inlined_call_operand.hbm [shape: f32[2,10], index: 9, kind: output, shape index: {}]  }
   0x1   :  { %v3062_v0 = vld [vmem:[%s4059_s1 + $0x40] sm:$0xff]   ;;  %v3066_v4 = vld [vmem:[%s4059_s1 + $0x48] sm:$0xff]   ;;  %v3070_v8 = vld [vmem:[%s4059_s1 + $0x50] sm:$0xff]   ;;  %v48_v37 = vunpack.c.l.s4 %v3300_v36 }
   0x2   :  { %v3063_v1 = vld [vmem:[%s4059_s1 + $0xc0] sm:$0xff]   ;;  %2731 = vmatprep.subr.bf16.mxu0 %v3062_v0  ;;  %v3067_v5 = vld [vmem:[%s4059_s1 + $0xc8] sm:$0xff]   ;;  %v3071_v9 = vld [vmem:[%s4059_s1 + $0xd0] sm:$0xff]   ;;  %v51_v33 = vshrl.u32 %v50_v28, 7 }
   0x3   :  { %v3064_v2 = vld [vmem:[%s4059_s1] sm:$0xff]   ;;  %2753 = vmatprep.subr.bf16.mxu1 %v3063_v1  ;;  %v3068_v6 = vld [vmem:[%s4059_s1 + $0x8] sm:$0xff]   ;;  %v3072_v10 = vld [vmem:[%s4059_s1 + $0x10] sm:$0xff]   ;;  %v49_v39 = vunpack.c.0.s8 %v48_v37 }
   0x4   :  { %v3065_v3 = vld [vmem:[%s4059_s1 + $0x80] sm:$0xff]   ;;  %2732 = vmatpush3.bf16.msra.mxu0 %v3064_v2  ;;  %v3069_v7 = vld [vmem:[%s4059_s1 + $0x88] sm:$0xff]   ;;  %v3073_v11 = vld [vmem:[%s4059_s1 + $0x90] sm:$0xff]  }
   0x5   :  { %2754 = vmatpush3.bf16.msra.mxu1 %v3065_v3  ;;  %2733 = vmatprep.subr.bf16.mxu0 %v3066_v4  ;;  %v3074_v12 = vld [vmem:[%s4059_s1 + $0x58] sm:$0xff]   ;;  %v3078_v16 = vld [vmem:[%s4059_s1 + $0x60] sm:$0xff]   ;;  %v3082_v20 = vld [vmem:[%s4059_s1 + $0x68] sm:$0xff]   ;;  %v3459_v41 = vsub.s32 %v49_v39, %v51_v33 }
   0x6   :  { %2755 = vmatprep.subr.bf16.mxu1 %v3067_v5  ;;  %v3075_v13 = vld [vmem:[%s4059_s1 + $0xd8] sm:$0xff]   ;;  %v3079_v17 = vld [vmem:[%s4059_s1 + $0xe0] sm:$0xff]   ;;  %v3083_v21 = vld [vmem:[%s4059_s1 + $0xe8] sm:$0xff]  }
   0x7   :  { %v3076_v14 = vld [vmem:[%s4059_s1 + $0x18] sm:$0xff]   ;;  %v3080_v18 = vld [vmem:[%s4059_s1 + $0x20] sm:$0xff]   ;;  %v3084_v22 = vld [vmem:[%s4059_s1 + $0x28] sm:$0xff]  }
   0x8   :  { %2734 = vmatpush3.bf16.msra.mxu0 %v3068_v6  ;;  %v3077_v15 = vld [vmem:[%s4059_s1 + $0x98] sm:$0xff]   ;;  %v3081_v19 = vld [vmem:[%s4059_s1 + $0xa0] sm:$0xff]   ;;  %v3085_v23 = vld [vmem:[%s4059_s1 + $0xa8] sm:$0xff]  }
   0x9   :  { %2756 = vmatpush3.bf16.msra.mxu1 %v3069_v7  ;;  %2735 = vmatprep.subr.bf16.mxu0 %v3070_v8  ;;  %v3086_v24 = vld [vmem:[%s4059_s1 + $0x70] sm:$0xff]   ;;  %v3090_v29 = vld [vmem:[%s4059_s1 + $0x78] sm:$0xff]   ;;  %v34_v34 = vld [vmem:[%s4058_s0] sm:$0xff] }
   0xa   :  { %2757 = vmatprep.subr.bf16.mxu1 %v3071_v9  ;;  %v3087_v25 = vld [vmem:[%s4059_s1 + $0xf0] sm:$0xff]   ;;  %v3091_v30 = vld [vmem:[%s4059_s1 + $0xf8] sm:$0xff]   ;;  %v3095_v35 = vld [vmem:[%s4059_s1 + $0x140] sm:$0xff]   ;;  %v46_v40 = vcombine.high %v34_v34, %v34_v34  ;;  %v53_v42 = vrot.slane %v34_v34, %v3459_v41 }
   0xb   :  { %v3088_v26 = vld [vmem:[%s4059_s1 + $0x30] sm:$0xff]   ;;  %v3092_v31 = vld [vmem:[%s4059_s1 + $0x38] sm:$0xff]   ;;  %v3096_v38 = vld [vmem:[%s4059_s1 + $0x1c0] sm:$0xff]  }
   0xc   :  { %2736 = vmatpush3.bf16.msra.mxu0 %v3072_v10  ;;  %v3089_v27 = vld [vmem:[%s4059_s1 + $0xb0] sm:$0xff]   ;;  %v3093_v32 = vld [vmem:[%s4059_s1 + $0xb8] sm:$0xff]   ;;  %v60_v43 = vrot.slane %v46_v40, %v3459_v41  ;;  %v61_v44 = vcombine.high %v53_v42, %v53_v42  ;;  %v3097_v46 = vld [vmem:[%s4059_s1 + $0x100] sm:$0xff]   ;;  %v172_v47 = vpack.c.bf16 %v53_v42, %v53_v42 }
   0xd   :  { %2758 = vmatpush3.bf16.msra.mxu1 %v3073_v11  ;;  %2737 = vmatprep.subr.bf16.mxu0 %v3074_v12  ;;  %v3098_v49 = vld [vmem:[%s4059_s1 + $0x180] sm:$0xff]   ;;  %v3099_v52 = vld [vmem:[%s4059_s1 + $0x148] sm:$0xff]   ;;  %v3103_v56 = vld [vmem:[%s4059_s1 + $0x150] sm:$0xff]  }
   0xe   :  { %2759 = vmatprep.subr.bf16.mxu1 %v3075_v13  ;;  %v62_v45 = vcombine.high %v60_v43, %v60_v43  ;;  %v174_v48 = vpack.c.bf16 %v60_v43, %v60_v43  ;;  %v173_v50 = vpack.c.bf16 %v61_v44, %v61_v44  ;;  %v3100_v53 = vld [vmem:[%s4059_s1 + $0x1c8] sm:$0xff]   ;;  %v3104_v57 = vld [vmem:[%s4059_s1 + $0x1d0] sm:$0xff]   ;;  %v3107_v60 = vld [vmem:[%s4059_s1 + $0x158] sm:$0xff]  }
   0xf   :  { %v3101_v54 = vld [vmem:[%s4059_s1 + $0x108] sm:$0xff]   ;;  %v3105_v58 = vld [vmem:[%s4059_s1 + $0x110] sm:$0xff]   ;;  %v3108_v61 = vld [vmem:[%s4059_s1 + $0x1d8] sm:$0xff]  }
  0x10   :  { %2738 = vmatpush3.bf16.msra.mxu0 %v3076_v14  ;;  %v175_v51 = vpack.c.bf16 %v62_v45, %v62_v45  ;;  %1771 = vmatprep.mubr.bf16.mxu0 %v173_v50  ;;  %v3102_v55 = vld [vmem:[%s4059_s1 + $0x188] sm:$0xff]   ;;  %v3106_v59 = vld [vmem:[%s4059_s1 + $0x190] sm:$0xff]   ;;  %v3109_v62 = vld [vmem:[%s4059_s1 + $0x118] sm:$0xff]  }
  0x11   :  { %2760 = vmatpush3.bf16.msra.mxu1 %v3077_v15  ;;  %2739 = vmatprep.subr.bf16.mxu0 %v3078_v16  ;;  %v3110_v63 = vld [vmem:[%s4059_s1 + $0x198] sm:$0xff]   ;;  %v3111_v0 = vld [vmem:[%s4059_s1 + $0x160] sm:$0xff]   ;;  %v3115_v4 = vld [vmem:[%s4059_s1 + $0x168] sm:$0xff]  }
  0x12   :  { %2761 = vmatprep.subr.bf16.mxu1 %v3079_v17  ;;  %1811 = vmatprep.mubr.bf16.mxu1 %v175_v51  ;;  %v3112_v1 = vld [vmem:[%s4059_s1 + $0x1e0] sm:$0xff]   ;;  %v3116_v5 = vld [vmem:[%s4059_s1 + $0x1e8] sm:$0xff]   ;;  %v3119_v8 = vld [vmem:[%s4059_s1 + $0x170] sm:$0xff]  }
  0x13   :  { %v3113_v2 = vld [vmem:[%s4059_s1 + $0x120] sm:$0xff]   ;;  %v3117_v6 = vld [vmem:[%s4059_s1 + $0x128] sm:$0xff]   ;;  %v3120_v9 = vld [vmem:[%s4059_s1 + $0x1f0] sm:$0xff]  }
  0x14   :  { %2740 = vmatpush3.bf16.msra.mxu0 %v3080_v18  ;;  %v3114_v3 = vld [vmem:[%s4059_s1 + $0x1a0] sm:$0xff]   ;;  %v3118_v7 = vld [vmem:[%s4059_s1 + $0x1a8] sm:$0xff]   ;;  %v3121_v11 = vld [vmem:[%s4059_s1 + $0x130] sm:$0xff]  }
  0x15   :  { %2762 = vmatpush3.bf16.msra.mxu1 %v3081_v19  ;;  %2741 = vmatprep.subr.bf16.mxu0 %v3082_v20  ;;  %v35_v10 = vld [vmem:[%s4058_s0 + $0x8] sm:$0xff]  ;;  %v3122_v14 = vld [vmem:[%s4059_s1 + $0x1b0] sm:$0xff]   ;;  %v3123_v15 = vld [vmem:[%s4059_s1 + $0x178] sm:$0xff]  }
  0x16   :  { %2763 = vmatprep.subr.bf16.mxu1 %v3083_v21  ;;  %v70_v12 = vrot.slane %v35_v10, %v3459_v41  ;;  %v63_v13 = vcombine.high %v35_v10, %v35_v10  ;;  %v3124_v18 = vld [vmem:[%s4059_s1 + $0x1f8] sm:$0xff]   ;;  %v3135_v33 = vld [vmem:[%s4059_s1 + $0x288] sm:$0xff]   ;;  %v3136_v34 = vld [vmem:[%s4059_s1 + $0x250] sm:$0xff]  }
  0x17   :  { %v3125_v19 = vld [vmem:[%s4059_s1 + $0x138] sm:$0xff]   ;;  %v3138_v36 = vld [vmem:[%s4059_s1 + $0x210] sm:$0xff]   ;;  %v3144_v43 = vld [vmem:[%s4059_s1 + $0x260] sm:$0xff]  }
  0x18   :  { %2742 = vmatpush3.bf16.msra.mxu0 %v3084_v22  ;;  %v78_v16 = vcombine.high %v70_v12, %v70_v12  ;;  %v77_v17 = vrot.slane %v63_v13, %v3459_v41  ;;  %v3126_v22 = vld [vmem:[%s4059_s1 + $0x1b8] sm:$0xff]   ;;  %v3139_v37 = vld [vmem:[%s4059_s1 + $0x290] sm:$0xff]   ;;  %v3145_v44 = vld [vmem:[%s4059_s1 + $0x2e0] sm:$0xff]  }
  0x19   :  { %2764 = vmatpush3.bf16.msra.mxu1 %v3085_v23  ;;  %2743 = vmatprep.subr.bf16.mxu0 %v3086_v24  ;;  %v3128_v24 = vld [vmem:[%s4059_s1 + $0x240] sm:$0xff]   ;;  %v3141_v39 = vld [vmem:[%s4059_s1 + $0x2d8] sm:$0xff]   ;;  %v3151_v50 = vld [vmem:[%s4059_s1 + $0x2a8] sm:$0xff]  }
  0x1a   :  { %2765 = vmatprep.subr.bf16.mxu1 %v3087_v25  ;;  %v177_v20 = vpack.c.bf16 %v78_v16, %v78_v16  ;;  %v79_v21 = vcombine.high %v77_v17, %v77_v17  ;;  %v3129_v25 = vld [vmem:[%s4059_s1 + $0x2c0] sm:$0xff]   ;;  %v178_v28 = vpack.c.bf16 %v77_v17, %v77_v17  ;;  %v3142_v40 = vld [vmem:[%s4059_s1 + $0x218] sm:$0xff]   ;;  %v3152_v51 = vld [vmem:[%s4059_s1 + $0x270] sm:$0xff]  }
  0x1b   :  { %v3143_v42 = vld [vmem:[%s4059_s1 + $0x298] sm:$0xff]   ;;  %v3146_v45 = vld [vmem:[%s4059_s1 + $0x220] sm:$0xff]   ;;  %v3166_v10 = vld [vmem:[%s4059_s1 + $0x3c8] sm:$0xff]  }
  0x1c   :  { %2744 = vmatpush3.bf16.msra.mxu0 %v3088_v26  ;;  %v179_v23 = vpack.c.bf16 %v79_v21, %v79_v21  ;;  %v3130_v26 = vld [vmem:[%s4059_s1 + $0x200] sm:$0xff]   ;;  %v3169_v13 = vld [vmem:[%s4059_s1 + $0x350] sm:$0xff]   ;;  %v3173_v17 = vld [vmem:[%s4059_s1 + $0x358] sm:$0xff]  }
  0x1d   :  { %2766 = vmatpush3.bf16.msra.mxu1 %v3089_v27  ;;  %2745 = vmatprep.subr.bf16.mxu0 %v3090_v29  ;;  %v176_v27 = vpack.c.bf16 %v70_v12, %v70_v12  ;;  %v3131_v29 = vld [vmem:[%s4059_s1 + $0x280] sm:$0xff]   ;;  %v3168_v12 = vld [vmem:[%s4059_s1 + $0x388] sm:$0xff]   ;;  %v3172_v16 = vld [vmem:[%s4059_s1 + $0x390] sm:$0xff]  }
  0x1e   :  { %2767 = vmatprep.subr.bf16.mxu1 %v3091_v30  ;;  %v3132_v30 = vld [vmem:[%s4059_s1 + $0x248] sm:$0xff]   ;;  %v3177_v21 = vld [vmem:[%s4059_s1 + $0x360] sm:$0xff]  }
  0x20   :  { %2746 = vmatpush3.bf16.msra.mxu0 %v3092_v31  ;;  %v3133_v31 = vld [vmem:[%s4059_s1 + $0x2c8] sm:$0xff]  }
  0x21   :  { %2768 = vmatpush3.bf16.msra.mxu1 %v3093_v32  ;;  %2775 = vmatprep.subr.bf16.mxu0 %v3095_v35  ;;  %v3134_v32 = vld [vmem:[%s4059_s1 + $0x208] sm:$0xff]   ;;  %v3137_v35 = vld [vmem:[%s4059_s1 + $0x2d0] sm:$0xff]  }
  0x22   :  { %2797 = vmatprep.subr.bf16.mxu1 %v3096_v38  ;;  %v3140_v38 = vld [vmem:[%s4059_s1 + $0x258] sm:$0xff]  }
  0x23   :  { %1772 = vmatmul.mubr.bf16.vlgmr.msra.gmra.mrb[0].mxu0 %v172_v47  ;;  %v3148_v47 = vld [vmem:[%s4059_s1 + $0x268] sm:$0xff]  }
  0x24   :  { %1812 = vmatmul.mubr.bf16.vlgmr.msra.gmra.mrb[0].mxu1 %v174_v48  ;;  %2776 = vmatpush3.bf16.msra.mxu0 %v3097_v46  ;;  %v3147_v46 = vld [vmem:[%s4059_s1 + $0x2a0] sm:$0xff]   ;;  %v3149_v48 = vld [vmem:[%s4059_s1 + $0x2e8] sm:$0xff]  }
  0x25   :  { %2798 = vmatpush3.bf16.msra.mxu1 %v3098_v49  ;;  %2777 = vmatprep.subr.bf16.mxu0 %v3099_v52  ;;  %v3150_v49 = vld [vmem:[%s4059_s1 + $0x228] sm:$0xff]   ;;  %v3153_v52 = vld [vmem:[%s4059_s1 + $0x2f0] sm:$0xff]  }
  0x26   :  { %2799 = vmatprep.subr.bf16.mxu1 %v3100_v53  ;;  %1851 = vmatprep.mubr.bf16.mxu0 %v177_v20  ;;  %v36_v53 = vld [vmem:[%s4058_s0 + $0x10] sm:$0xff]  ;;  %v3176_v20 = vld [vmem:[%s4059_s1 + $0x398] sm:$0xff]  }
  0x27   :  { %1891 = vmatprep.mubr.bf16.mxu1 %v179_v23  ;;  %v3179_v23 = vld [vmem:[%s4059_s1 + $0x320] sm:$0xff]  }
  0x28   :  { %2778 = vmatpush3.bf16.msra.mxu0 %v3101_v54  ;;  %v3154_v54 = vld [vmem:[%s4059_s1 + $0x230] sm:$0xff]  }
  0x29   :  { %2800 = vmatpush3.bf16.msra.mxu1 %v3102_v55  ;;  %2779 = vmatprep.subr.bf16.mxu0 %v3103_v56  ;;  %v87_v55 = vrot.slane %v36_v53, %v3459_v41  ;;  %v80_v56 = vcombine.high %v36_v53, %v36_v53  ;;  %v3199_v53 = vld [vmem:[%s4059_s1 + $0x4c8] sm:$0xff]  }
  0x2a   :  { %2801 = vmatprep.subr.bf16.mxu1 %v3104_v57  ;;  %v3155_v57 = vld [vmem:[%s4059_s1 + $0x2b0] sm:$0xff]  }
  0x2c   :  { %2780 = vmatpush3.bf16.msra.mxu0 %v3105_v58  ;;  %v3156_v58 = vld [vmem:[%s4059_s1 + $0x278] sm:$0xff]  }
  0x2d   :  { %2802 = vmatpush3.bf16.msra.mxu1 %v3106_v59  ;;  %2781 = vmatprep.subr.bf16.mxu0 %v3107_v60  ;;  %v95_v59 = vcombine.high %v87_v55, %v87_v55  ;;  %v94_v60 = vrot.slane %v80_v56, %v3459_v41  ;;  %v3202_v56 = vld [vmem:[%s4059_s1 + $0x450] sm:$0xff]  }
  0x2e   :  { %2803 = vmatprep.subr.bf16.mxu1 %v3108_v61  ;;  %v3157_v61 = vld [vmem:[%s4059_s1 + $0x2f8] sm:$0xff]  }
  0x30   :  { %2782 = vmatpush3.bf16.msra.mxu0 %v3109_v62  ;;  %v3158_v62 = vld [vmem:[%s4059_s1 + $0x238] sm:$0xff]  }
  0x31   :  { %2804 = vmatpush3.bf16.msra.mxu1 %v3110_v63  ;;  %2783 = vmatprep.subr.bf16.mxu0 %v3111_v0  ;;  %v181_v63 = vpack.c.bf16 %v95_v59, %v95_v59  ;;  %v96_v0 = vcombine.high %v94_v60, %v94_v60  ;;  %v3205_v59 = vld [vmem:[%s4059_s1 + $0x490] sm:$0xff]  }
  0x32   :  { %2805 = vmatprep.subr.bf16.mxu1 %v3112_v1  ;;  %v3159_v1 = vld [vmem:[%s4059_s1 + $0x2b8] sm:$0xff]  }
  0x34   :  { %2784 = vmatpush3.bf16.msra.mxu0 %v3113_v2  ;;  %v183_v2 = vpack.c.bf16 %v96_v0, %v96_v0  ;;  %v3210_v0 = vld [vmem:[%s4059_s1 + $0x460] sm:$0xff]  }
  0x35   :  { %2806 = vmatpush3.bf16.msra.mxu1 %v3114_v3  ;;  %2785 = vmatprep.subr.bf16.mxu0 %v3115_v4  ;;  %v3161_v3 = vld [vmem:[%s4059_s1 + $0x340] sm:$0xff]  }
  0x36   :  { %2807 = vmatprep.subr.bf16.mxu1 %v3116_v5  ;;  %v3162_v4 = vld [vmem:[%s4059_s1 + $0x3c0] sm:$0xff]  }
  0x37   :  { %v3163_v5 = vld [vmem:[%s4059_s1 + $0x300] sm:$0xff]  }
  0x38   :  { %2786 = vmatpush3.bf16.msra.mxu0 %v3117_v6  ;;  %v180_v6 = vpack.c.bf16 %v87_v55, %v87_v55  ;;  %v3201_v55 = vld [vmem:[%s4059_s1 + $0x488] sm:$0xff]  }
  0x39   :  { %2808 = vmatpush3.bf16.msra.mxu1 %v3118_v7  ;;  %2787 = vmatprep.subr.bf16.mxu0 %v3119_v8  ;;  %v182_v7 = vpack.c.bf16 %v94_v60, %v94_v60  ;;  %v3164_v8 = vld [vmem:[%s4059_s1 + $0x380] sm:$0xff]   ;;  %v3206_v60 = vld [vmem:[%s4059_s1 + $0x458] sm:$0xff]  }
  0x3a   :  { %2809 = vmatprep.subr.bf16.mxu1 %v3120_v9  ;;  %v3165_v9 = vld [vmem:[%s4059_s1 + $0x348] sm:$0xff]  }
  0x3c   :  { %2788 = vmatpush3.bf16.msra.mxu0 %v3121_v11  ;;  %v3167_v11 = vld [vmem:[%s4059_s1 + $0x308] sm:$0xff]  }
  0x3d   :  { %2810 = vmatpush3.bf16.msra.mxu1 %v3122_v14  ;;  %2789 = vmatprep.subr.bf16.mxu0 %v3123_v15  ;;  %v3170_v14 = vld [vmem:[%s4059_s1 + $0x3d0] sm:$0xff]  }
  0x3e   :  { %2811 = vmatprep.subr.bf16.mxu1 %v3124_v18  ;;  %v3171_v15 = vld [vmem:[%s4059_s1 + $0x310] sm:$0xff]   ;;  %v3174_v18 = vld [vmem:[%s4059_s1 + $0x3d8] sm:$0xff]  }
  0x40   :  { %2790 = vmatpush3.bf16.msra.mxu0 %v3125_v19  ;;  %v3175_v19 = vld [vmem:[%s4059_s1 + $0x318] sm:$0xff]  }
  0x41   :  { %2812 = vmatpush3.bf16.msra.mxu1 %v3126_v22  ;;  %2819 = vmatprep.subr.bf16.mxu0 %v3128_v24  ;;  %v3178_v22 = vld [vmem:[%s4059_s1 + $0x3e0] sm:$0xff]  }
  0x42   :  { %2841 = vmatprep.subr.bf16.mxu1 %v3129_v25  ;;  %v3180_v24 = vld [vmem:[%s4059_s1 + $0x3a0] sm:$0xff]   ;;  %v3181_v25 = vld [vmem:[%s4059_s1 + $0x368] sm:$0xff]  }
  0x43   :  { %1852 = vmatmul.mubr.bf16.vlgmr.msra.gmra.mrb[4].mxu0 %v176_v27  ;;  %v3183_v27 = vld [vmem:[%s4059_s1 + $0x328] sm:$0xff]  }
  0x44   :  { %1892 = vmatmul.mubr.bf16.vlgmr.msra.gmra.mrb[4].mxu1 %v178_v28  ;;  %2820 = vmatpush3.bf16.msra.mxu0 %v3130_v26  ;;  %v3182_v26 = vld [vmem:[%s4059_s1 + $0x3e8] sm:$0xff]  }
  0x45   :  { %2842 = vmatpush3.bf16.msra.mxu1 %v3131_v29  ;;  %2821 = vmatprep.subr.bf16.mxu0 %v3132_v30  ;;  %v3184_v28 = vld [vmem:[%s4059_s1 + $0x3a8] sm:$0xff]   ;;  %v3185_v29 = vld [vmem:[%s4059_s1 + $0x370] sm:$0xff]  }
  0x46   :  { %2843 = vmatprep.subr.bf16.mxu1 %v3133_v31  ;;  %1931 = vmatprep.mubr.bf16.mxu0 %v181_v63  ;;  %v3186_v30 = vld [vmem:[%s4059_s1 + $0x3f0] sm:$0xff]   ;;  %v3209_v63 = vld [vmem:[%s4059_s1 + $0x498] sm:$0xff]  }
  0x47   :  { %1971 = vmatprep.mubr.bf16.mxu1 %v183_v2  ;;  %v3187_v31 = vld [vmem:[%s4059_s1 + $0x330] sm:$0xff]   ;;  %v3212_v2 = vld [vmem:[%s4059_s1 + $0x420] sm:$0xff]  }
  0x48   :  { %2822 = vmatpush3.bf16.msra.mxu0 %v3134_v32  ;;  %v37_v32 = vld [vmem:[%s4058_s0 + $0x18] sm:$0xff] }
  0x49   :  { %2844 = vmatpush3.bf16.msra.mxu1 %v3135_v33  ;;  %2823 = vmatprep.subr.bf16.mxu0 %v3136_v34  ;;  %v3188_v33 = vld [vmem:[%s4059_s1 + $0x3b0] sm:$0xff]   ;;  %v104_v34 = vrot.slane %v37_v32, %v3459_v41 }
  0x4a   :  { %2845 = vmatprep.subr.bf16.mxu1 %v3137_v35  ;;  %v97_v35 = vcombine.high %v37_v32, %v37_v32  ;;  %v3233_v32 = vld [vmem:[%s4059_s1 + $0x508] sm:$0xff]  }
  0x4c   :  { %2824 = vmatpush3.bf16.msra.mxu0 %v3138_v36  ;;  %v3189_v36 = vld [vmem:[%s4059_s1 + $0x378] sm:$0xff]  }
  0x4d   :  { %2846 = vmatpush3.bf16.msra.mxu1 %v3139_v37  ;;  %2825 = vmatprep.subr.bf16.mxu0 %v3140_v38  ;;  %v3190_v37 = vld [vmem:[%s4059_s1 + $0x3f8] sm:$0xff]   ;;  %v112_v38 = vcombine.high %v104_v34, %v104_v34 }
  0x4e   :  { %2847 = vmatprep.subr.bf16.mxu1 %v3141_v39  ;;  %v111_v39 = vrot.slane %v97_v35, %v3459_v41  ;;  %v3236_v35 = vld [vmem:[%s4059_s1 + $0x5d0] sm:$0xff]  }
  0x50   :  { %2826 = vmatpush3.bf16.msra.mxu0 %v3142_v40  ;;  %v3191_v40 = vld [vmem:[%s4059_s1 + $0x338] sm:$0xff]  }
  0x51   :  { %2848 = vmatpush3.bf16.msra.mxu1 %v3143_v42  ;;  %2827 = vmatprep.subr.bf16.mxu0 %v3144_v43  ;;  %v3192_v42 = vld [vmem:[%s4059_s1 + $0x3b8] sm:$0xff]   ;;  %v185_v43 = vpack.c.bf16 %v112_v38, %v112_v38 }
  0x52   :  { %2849 = vmatprep.subr.bf16.mxu1 %v3145_v44  ;;  %v113_v44 = vcombine.high %v111_v39, %v111_v39  ;;  %v3239_v38 = vld [vmem:[%s4059_s1 + $0x558] sm:$0xff]  }
  0x54   :  { %2828 = vmatpush3.bf16.msra.mxu0 %v3146_v45  ;;  %v3194_v45 = vld [vmem:[%s4059_s1 + $0x440] sm:$0xff]  }
  0x55   :  { %2850 = vmatpush3.bf16.msra.mxu1 %v3147_v46  ;;  %2829 = vmatprep.subr.bf16.mxu0 %v3148_v47  ;;  %v187_v46 = vpack.c.bf16 %v113_v44, %v113_v44  ;;  %v3195_v47 = vld [vmem:[%s4059_s1 + $0x4c0] sm:$0xff]  }
  0x56   :  { %2851 = vmatprep.subr.bf16.mxu1 %v3149_v48  ;;  %v3196_v48 = vld [vmem:[%s4059_s1 + $0x400] sm:$0xff]  }
  0x57   :  { %v3244_v44 = vld [vmem:[%s4059_s1 + $0x5e0] sm:$0xff]  }
  0x58   :  { %2830 = vmatpush3.bf16.msra.mxu0 %v3150_v49  ;;  %v184_v49 = vpack.c.bf16 %v104_v34, %v104_v34  ;;  %v3235_v34 = vld [vmem:[%s4059_s1 + $0x550] sm:$0xff]  }
  0x59   :  { %2852 = vmatpush3.bf16.msra.mxu1 %v3151_v50  ;;  %2831 = vmatprep.subr.bf16.mxu0 %v3152_v51  ;;  %v186_v50 = vpack.c.bf16 %v111_v39, %v111_v39  ;;  %v3197_v51 = vld [vmem:[%s4059_s1 + $0x480] sm:$0xff]   ;;  %v3240_v39 = vld [vmem:[%s4059_s1 + $0x5d8] sm:$0xff]  }
  0x5a   :  { %2853 = vmatprep.subr.bf16.mxu1 %v3153_v52  ;;  %v3198_v52 = vld [vmem:[%s4059_s1 + $0x448] sm:$0xff]  }
  0x5c   :  { %2832 = vmatpush3.bf16.msra.mxu0 %v3154_v54  ;;  %v3200_v54 = vld [vmem:[%s4059_s1 + $0x408] sm:$0xff]  }
  0x5d   :  { %2854 = vmatpush3.bf16.msra.mxu1 %v3155_v57  ;;  %2833 = vmatprep.subr.bf16.mxu0 %v3156_v58  ;;  %v3203_v57 = vld [vmem:[%s4059_s1 + $0x4d0] sm:$0xff]  }
  0x5e   :  { %2855 = vmatprep.subr.bf16.mxu1 %v3157_v61  ;;  %v3204_v58 = vld [vmem:[%s4059_s1 + $0x410] sm:$0xff]   ;;  %v3207_v61 = vld [vmem:[%s4059_s1 + $0x4d8] sm:$0xff]  }
  0x60   :  { %2834 = vmatpush3.bf16.msra.mxu0 %v3158_v62  ;;  %v3208_v62 = vld [vmem:[%s4059_s1 + $0x418] sm:$0xff]  }
  0x61   :  { %2856 = vmatpush3.bf16.msra.mxu1 %v3159_v1  ;;  %2863 = vmatprep.subr.bf16.mxu0 %v3161_v3  ;;  %v3211_v1 = vld [vmem:[%s4059_s1 + $0x4e0] sm:$0xff]  }
  0x62   :  { %2885 = vmatprep.subr.bf16.mxu1 %v3162_v4  ;;  %v3213_v3 = vld [vmem:[%s4059_s1 + $0x4a0] sm:$0xff]   ;;  %v3214_v4 = vld [vmem:[%s4059_s1 + $0x468] sm:$0xff]  }
  0x63   :  { %1932 = vmatmul.mubr.bf16.vlgmr.msra.gmra.mrb[8].mxu0 %v180_v6  ;;  %v3216_v6 = vld [vmem:[%s4059_s1 + $0x428] sm:$0xff]  }
  0x64   :  { %1972 = vmatmul.mubr.bf16.vlgmr.msra.gmra.mrb[8].mxu1 %v182_v7  ;;  %2864 = vmatpush3.bf16.msra.mxu0 %v3163_v5  ;;  %v3215_v5 = vld [vmem:[%s4059_s1 + $0x4e8] sm:$0xff]  }
  0x65   :  { %2886 = vmatpush3.bf16.msra.mxu1 %v3164_v8  ;;  %2865 = vmatprep.subr.bf16.mxu0 %v3165_v9  ;;  %v3217_v7 = vld [vmem:[%s4059_s1 + $0x4a8] sm:$0xff]   ;;  %v3218_v8 = vld [vmem:[%s4059_s1 + $0x470] sm:$0xff]  }
  0x66   :  { %2887 = vmatprep.subr.bf16.mxu1 %v3166_v10  ;;  %2011 = vmatprep.mubr.bf16.mxu0 %v185_v43  ;;  %v3219_v9 = vld [vmem:[%s4059_s1 + $0x4f0] sm:$0xff]   ;;  %v3243_v43 = vld [vmem:[%s4059_s1 + $0x560] sm:$0xff]  }
  0x67   :  { %2051 = vmatprep.mubr.bf16.mxu1 %v187_v46  ;;  %v3220_v10 = vld [vmem:[%s4059_s1 + $0x430] sm:$0xff]   ;;  %v3246_v46 = vld [vmem:[%s4059_s1 + $0x5a0] sm:$0xff]  }
  0x68   :  { %2866 = vmatpush3.bf16.msra.mxu0 %v3167_v11  ;;  %v38_v11 = vld [vmem:[%s4058_s0 + $0x20] sm:$0xff] }
  0x69   :  { %2888 = vmatpush3.bf16.msra.mxu1 %v3168_v12  ;;  %2867 = vmatprep.subr.bf16.mxu0 %v3169_v13  ;;  %v3221_v12 = vld [vmem:[%s4059_s1 + $0x4b0] sm:$0xff]   ;;  %v121_v13 = vrot.slane %v38_v11, %v3459_v41 }
  0x6a   :  { %2889 = vmatprep.subr.bf16.mxu1 %v3170_v14  ;;  %v114_v14 = vcombine.high %v38_v11, %v38_v11 }
  0x6c   :  { %2868 = vmatpush3.bf16.msra.mxu0 %v3171_v15  ;;  %v3222_v15 = vld [vmem:[%s4059_s1 + $0x478] sm:$0xff]  }
  0x6d   :  { %2890 = vmatpush3.bf16.msra.mxu1 %v3172_v16  ;;  %2869 = vmatprep.subr.bf16.mxu0 %v3173_v17  ;;  %v3223_v16 = vld [vmem:[%s4059_s1 + $0x4f8] sm:$0xff]   ;;  %v129_v17 = vcombine.high %v121_v13, %v121_v13 }
  0x6e   :  { %2891 = vmatprep.subr.bf16.mxu1 %v3174_v18  ;;  %v128_v18 = vrot.slane %v114_v14, %v3459_v41 }
  0x70   :  { %2870 = vmatpush3.bf16.msra.mxu0 %v3175_v19  ;;  %v3224_v19 = vld [vmem:[%s4059_s1 + $0x438] sm:$0xff]  }
  0x71   :  { %2892 = vmatpush3.bf16.msra.mxu1 %v3176_v20  ;;  %2871 = vmatprep.subr.bf16.mxu0 %v3177_v21  ;;  %v3225_v20 = vld [vmem:[%s4059_s1 + $0x4b8] sm:$0xff]   ;;  %v189_v21 = vpack.c.bf16 %v129_v17, %v129_v17 }
  0x72   :  { %2893 = vmatprep.subr.bf16.mxu1 %v3178_v22  ;;  %v130_v22 = vcombine.high %v128_v18, %v128_v18 }
  0x74   :  { %2872 = vmatpush3.bf16.msra.mxu0 %v3179_v23  ;;  %v3227_v23 = vld [vmem:[%s4059_s1 + $0x540] sm:$0xff]  }
  0x75   :  { %2894 = vmatpush3.bf16.msra.mxu1 %v3180_v24  ;;  %2873 = vmatprep.subr.bf16.mxu0 %v3181_v25  ;;  %v191_v24 = vpack.c.bf16 %v130_v22, %v130_v22  ;;  %v3228_v25 = vld [vmem:[%s4059_s1 + $0x5c0] sm:$0xff]  }
  0x76   :  { %2895 = vmatprep.subr.bf16.mxu1 %v3182_v26  ;;  %v3229_v26 = vld [vmem:[%s4059_s1 + $0x500] sm:$0xff]  }
  0x78   :  { %2874 = vmatpush3.bf16.msra.mxu0 %v3183_v27  ;;  %v188_v27 = vpack.c.bf16 %v121_v13, %v121_v13 }
  0x79   :  { %2896 = vmatpush3.bf16.msra.mxu1 %v3184_v28  ;;  %2875 = vmatprep.subr.bf16.mxu0 %v3185_v29  ;;  %v190_v28 = vpack.c.bf16 %v128_v18, %v128_v18  ;;  %v3230_v29 = vld [vmem:[%s4059_s1 + $0x580] sm:$0xff]  }
  0x7a   :  { %2897 = vmatprep.subr.bf16.mxu1 %v3186_v30  ;;  %v3231_v30 = vld [vmem:[%s4059_s1 + $0x548] sm:$0xff]  }
  0x7c   :  { %2876 = vmatpush3.bf16.msra.mxu0 %v3187_v31  ;;  %v3232_v31 = vld [vmem:[%s4059_s1 + $0x5c8] sm:$0xff]  }
  0x7d   :  { %2898 = vmatpush3.bf16.msra.mxu1 %v3188_v33  ;;  %2877 = vmatprep.subr.bf16.mxu0 %v3189_v36  ;;  %v3234_v33 = vld [vmem:[%s4059_s1 + $0x588] sm:$0xff]   ;;  %v3237_v36 = vld [vmem:[%s4059_s1 + $0x510] sm:$0xff]  }
  0x7e   :  { %2899 = vmatprep.subr.bf16.mxu1 %v3190_v37  ;;  %v3238_v37 = vld [vmem:[%s4059_s1 + $0x590] sm:$0xff]  }
  0x80   :  { %2878 = vmatpush3.bf16.msra.mxu0 %v3191_v40  ;;  %v3241_v40 = vld [vmem:[%s4059_s1 + $0x518] sm:$0xff]  }
  0x81   :  { %2900 = vmatpush3.bf16.msra.mxu1 %v3192_v42  ;;  %2907 = vmatprep.subr.bf16.mxu0 %v3194_v45  ;;  %v3242_v42 = vld [vmem:[%s4059_s1 + $0x598] sm:$0xff]   ;;  %v3245_v45 = vld [vmem:[%s4059_s1 + $0x520] sm:$0xff]  }
  0x82   :  { %2929 = vmatprep.subr.bf16.mxu1 %v3195_v47  ;;  %v3247_v47 = vld [vmem:[%s4059_s1 + $0x568] sm:$0xff]  }
  0x83   :  { %2012 = vmatmul.mubr.bf16.vlgmr.msra.gmra.mrb[12].mxu0 %v184_v49  ;;  %v3249_v49 = vld [vmem:[%s4059_s1 + $0x528] sm:$0xff]  }
  0x84   :  { %2052 = vmatmul.mubr.bf16.vlgmr.msra.gmra.mrb[12].mxu1 %v186_v50  ;;  %2908 = vmatpush3.bf16.msra.mxu0 %v3196_v48  ;;  %v3248_v48 = vld [vmem:[%s4059_s1 + $0x5e8] sm:$0xff]  }
  0x85   :  { %2930 = vmatpush3.bf16.msra.mxu1 %v3197_v51  ;;  %2909 = vmatprep.subr.bf16.mxu0 %v3198_v52  ;;  %v3250_v50 = vld [vmem:[%s4059_s1 + $0x5a8] sm:$0xff]   ;;  %v3251_v51 = vld [vmem:[%s4059_s1 + $0x570] sm:$0xff]  }
  0x86   :  { %2931 = vmatprep.subr.bf16.mxu1 %v3199_v53  ;;  %2091 = vmatprep.mubr.bf16.mxu0 %v189_v21  ;;  %v3252_v52 = vld [vmem:[%s4059_s1 + $0x5f0] sm:$0xff]  }
  0x87   :  { %2131 = vmatprep.mubr.bf16.mxu1 %v191_v24  ;;  %v3253_v53 = vld [vmem:[%s4059_s1 + $0x530] sm:$0xff]  }
  0x88   :  { %2910 = vmatpush3.bf16.msra.mxu0 %v3200_v54  ;;  %v3254_v54 = vld [vmem:[%s4059_s1 + $0x5b0] sm:$0xff]  }
  0x89   :  { %2932 = vmatpush3.bf16.msra.mxu1 %v3201_v55  ;;  %2911 = vmatprep.subr.bf16.mxu0 %v3202_v56  ;;  %v39_v55 = vld [vmem:[%s4058_s0 + $0x28] sm:$0xff]  ;;  %v3255_v56 = vld [vmem:[%s4059_s1 + $0x578] sm:$0xff]  }
  0x8a   :  { %2933 = vmatprep.subr.bf16.mxu1 %v3203_v57  ;;  %v3256_v57 = vld [vmem:[%s4059_s1 + $0x5f8] sm:$0xff]  }
  0x8c   :  { %2912 = vmatpush3.bf16.msra.mxu0 %v3204_v58  ;;  %v138_v58 = vrot.slane %v39_v55, %v3459_v41 }
  0x8d   :  { %2934 = vmatpush3.bf16.msra.mxu1 %v3205_v59  ;;  %2913 = vmatprep.subr.bf16.mxu0 %v3206_v60  ;;  %v131_v59 = vcombine.high %v39_v55, %v39_v55 }
  0x8e   :  { %2935 = vmatprep.subr.bf16.mxu1 %v3207_v61  ;;  %v146_v60 = vcombine.high %v138_v58, %v138_v58 }
  0x8f   :  { %v145_v61 = vrot.slane %v131_v59, %v3459_v41 }
  0x90   :  { %2914 = vmatpush3.bf16.msra.mxu0 %v3208_v62  ;;  %v3257_v62 = vld [vmem:[%s4059_s1 + $0x538] sm:$0xff]  }
  0x91   :  { %2936 = vmatpush3.bf16.msra.mxu1 %v3209_v63  ;;  %2915 = vmatprep.subr.bf16.mxu0 %v3210_v0  ;;  %v3258_v63 = vld [vmem:[%s4059_s1 + $0x5b8] sm:$0xff]   ;;  %v193_v0 = vpack.c.bf16 %v146_v60, %v146_v60 }
  0x92   :  { %2937 = vmatprep.subr.bf16.mxu1 %v3211_v1  ;;  %v147_v1 = vcombine.high %v145_v61, %v145_v61 }
  0x94   :  { %2916 = vmatpush3.bf16.msra.mxu0 %v3212_v2  ;;  %v195_v2 = vpack.c.bf16 %v147_v1, %v147_v1 }
  0x95   :  { %2938 = vmatpush3.bf16.msra.mxu1 %v3213_v3  ;;  %2917 = vmatprep.subr.bf16.mxu0 %v3214_v4  ;;  %v192_v3 = vpack.c.bf16 %v138_v58, %v138_v58  ;;  %v194_v4 = vpack.c.bf16 %v145_v61, %v145_v61 }
  0x96   :  { %2939 = vmatprep.subr.bf16.mxu1 %v3215_v5 }
  0x98   :  { %2918 = vmatpush3.bf16.msra.mxu0 %v3216_v6 }
  0x99   :  { %2940 = vmatpush3.bf16.msra.mxu1 %v3217_v7  ;;  %2919 = vmatprep.subr.bf16.mxu0 %v3218_v8 }
  0x9a   :  { %2941 = vmatprep.subr.bf16.mxu1 %v3219_v9 }
  0x9c   :  { %2920 = vmatpush3.bf16.msra.mxu0 %v3220_v10 }
  0x9d   :  { %2942 = vmatpush3.bf16.msra.mxu1 %v3221_v12  ;;  %2921 = vmatprep.subr.bf16.mxu0 %v3222_v15 }
  0x9e   :  { %2943 = vmatprep.subr.bf16.mxu1 %v3223_v16 }
  0xa0   :  { %2922 = vmatpush3.bf16.msra.mxu0 %v3224_v19 }
  0xa1   :  { %2944 = vmatpush3.bf16.msra.mxu1 %v3225_v20  ;;  %2951 = vmatprep.subr.bf16.mxu0 %v3227_v23 }
  0xa2   :  { %2973 = vmatprep.subr.bf16.mxu1 %v3228_v25 }
  0xa3   :  { %2092 = vmatmul.mubr.bf16.vlgmr.msra.gmra.mrb[16].mxu0 %v188_v27 }
  0xa4   :  { %2132 = vmatmul.mubr.bf16.vlgmr.msra.gmra.mrb[16].mxu1 %v190_v28  ;;  %2952 = vmatpush3.bf16.msra.mxu0 %v3229_v26 }
  0xa5   :  { %2974 = vmatpush3.bf16.msra.mxu1 %v3230_v29  ;;  %2953 = vmatprep.subr.bf16.mxu0 %v3231_v30 }
  0xa6   :  { %2975 = vmatprep.subr.bf16.mxu1 %v3232_v31  ;;  %2171 = vmatprep.mubr.bf16.mxu0 %v193_v0 }
  0xa7   :  { %2211 = vmatprep.mubr.bf16.mxu1 %v195_v2 }
  0xa8   :  { %2954 = vmatpush3.bf16.msra.mxu0 %v3233_v32 }
  0xa9   :  { %2976 = vmatpush3.bf16.msra.mxu1 %v3234_v33  ;;  %2955 = vmatprep.subr.bf16.mxu0 %v3235_v34 }
  0xaa   :  { %2977 = vmatprep.subr.bf16.mxu1 %v3236_v35 }
  0xac   :  { %2956 = vmatpush3.bf16.msra.mxu0 %v3237_v36 }
  0xad   :  { %2978 = vmatpush3.bf16.msra.mxu1 %v3238_v37  ;;  %2957 = vmatprep.subr.bf16.mxu0 %v3239_v38 }
  0xae   :  { %2979 = vmatprep.subr.bf16.mxu1 %v3240_v39 }
  0xb0   :  { %2958 = vmatpush3.bf16.msra.mxu0 %v3241_v40 }
  0xb1   :  { %2980 = vmatpush3.bf16.msra.mxu1 %v3242_v42  ;;  %2959 = vmatprep.subr.bf16.mxu0 %v3243_v43 }
  0xb2   :  { %2981 = vmatprep.subr.bf16.mxu1 %v3244_v44 }
  0xb4   :  { %2960 = vmatpush3.bf16.msra.mxu0 %v3245_v45 }
  0xb5   :  { %2982 = vmatpush3.bf16.msra.mxu1 %v3246_v46  ;;  %2961 = vmatprep.subr.bf16.mxu0 %v3247_v47 }
  0xb6   :  { %2983 = vmatprep.subr.bf16.mxu1 %v3248_v48 }
  0xb8   :  { %2962 = vmatpush3.bf16.msra.mxu0 %v3249_v49 }
  0xb9   :  { %2984 = vmatpush3.bf16.msra.mxu1 %v3250_v50  ;;  %2963 = vmatprep.subr.bf16.mxu0 %v3251_v51 }
  0xba   :  { %2985 = vmatprep.subr.bf16.mxu1 %v3252_v52 }
  0xbc   :  { %2964 = vmatpush3.bf16.msra.mxu0 %v3253_v53 }
  0xbd   :  { %2986 = vmatpush3.bf16.msra.mxu1 %v3254_v54  ;;  %2965 = vmatprep.subr.bf16.mxu0 %v3255_v56 }
  0xbe   :  { %2987 = vmatprep.subr.bf16.mxu1 %v3256_v57 }
  0xc0   :  { %2966 = vmatpush3.bf16.msra.mxu0 %v3257_v62 }
  0xc1   :  { %2988 = vmatpush3.bf16.msra.mxu1 %v3258_v63 }
  0xc2   :  { %14 = vsyncpa [#allocation3], 0  ;;  %v2517_v6 = vld [vmem:[%s4060_s2] ss:$0 sm:$0xff]  ;;  %v3301_v18 = vmov 0.0   ;;  %v3261_v19 = vld [vmem:[%s4061_s3 + $0x8] sm:$0xff]  }
  0xc3   :  { %2172 = vmatmul.mubr.bf16.vlgmr.msra.gmra.mrb[20].mxu0 %v192_v3  ;;  %v3260_v17 = vld [vmem:[%s4061_s3] sm:$0xff]   ;;  %3014 = vmatprep.subr.bf16.mxu0 %v3301_v18  ;;  %v3262_v30 = vld [vmem:[%s4061_s3 + $0x10] sm:$0xff]   ;;  %v3263_v33 = vld [vmem:[%s4061_s3 + $0x18] sm:$0xff]   ;;  %vm3302_vm0 = vmmov 0   ;;  %vm2260_vm1 = vcmask 523264   ;;  %s3303_s16 = smov [#allocation2]  }
  0xc4   :  { %2212 = vmatmul.mubr.bf16.vlgmr.msra.gmra.mrb[20].mxu1 %v194_v4  ;;  %3026 = vmatprep.subr.bf16.mxu1 %v3301_v18  ;;  %v3264_v34 = vld [vmem:[%s4063_s5] sm:$0xff]   ;;  %v3265_v35 = vld [vmem:[%s4063_s5 + $0x8] sm:$0xff]   ;;  %v3266_v36 = vld [vmem:[%s4063_s5 + $0x10] sm:$0xff]   ;;  %vm2501_vm2 = vcmask 74752  }
  0xc5   :  { %3015 = vmatpush3.bf16.msra.mxu0 %v3260_v17  ;;  %3022 = vmatprep.mubr.msk.bf16.mxu0 %vm3302_vm0, %v3301_v18  ;;  %v3267_v37 = vld [vmem:[%s4063_s5 + $0x18] sm:$0xff]   ;;  %v3268_v38 = vld [vmem:[%s4063_s5 + $0x20] sm:$0xff]   ;;  %v3269_v39 = vld [vmem:[%s4063_s5 + $0x28] sm:$0xff]  }
  0xc6   :  { %3016 = vmatprep.subr.bf16.mxu0 %v3301_v18  ;;  %3042 = vmatprep.mubr.msk.bf16.mxu1 %vm3302_vm0, %v3301_v18 }
  0xc7   :  { %3027 = vmatpush3.bf16.msra.mxu1 %v3264_v34 }
  0xc8   :  { %3028 = vmatprep.subr.bf16.mxu1 %v3301_v18 }
  0xc9   :  { %3017 = vmatpush3.bf16.msra.mxu0 %v3261_v19 }
  0xca   :  { %3018 = vmatprep.subr.bf16.mxu0 %v3301_v18 }
  0xcb   :  { %3029 = vmatpush3.bf16.msra.mxu1 %v3265_v35 }
  0xcc   :  { %3030 = vmatprep.subr.bf16.mxu1 %v3301_v18 }
  0xcd   :  { %3019 = vmatpush3.bf16.msra.mxu0 %v3262_v30  ;;  %v3273_v30 = vld [vmem:[%s4065_s7 + $0x8] sm:$0xff]  }
  0xce   :  { %3020 = vmatprep.subr.bf16.mxu0 %v3301_v18 }
  0xcf   :  { %3031 = vmatpush3.bf16.msra.mxu1 %v3266_v36 }
  0xd0   :  { %3032 = vmatprep.subr.bf16.mxu1 %v3301_v18 }
  0xd1   :  { %3021 = vmatpush3.bf16.msra.mxu0 %v3263_v33 }
  0xd2   :  { %3046 = vmatprep.subr.bf16.mxu0 %v3301_v18 }
  0xd3   :  { %3033 = vmatpush3.bf16.msra.mxu1 %v3267_v37 }
  0xd4   :  { %3034 = vmatprep.subr.bf16.mxu1 %v3301_v18 }
  0xd7   :  { %3035 = vmatpush3.bf16.msra.mxu1 %v3268_v38 }
  0xd8   :  { %3036 = vmatprep.subr.bf16.mxu1 %v3301_v18 }
  0xdb   :  { %3037 = vmatpush3.bf16.msra.mxu1 %v3269_v39  ;;  %v3274_v39 = vld [vmem:[%s4065_s7 + $0x10] sm:$0xff]  }
  0xdc   :  { %3038 = vmatprep.subr.bf16.mxu1 %v3301_v18 }
  0xf6   :  { %v2747_v41 = vpop.f32.mrb[0].mxu0 }
  0xf7   :  { %v2769_v5 = vpop.f32.mrb[0].mxu1  ;;  %v2748_v7 = vpop.f32.mrb[1].mxu0 }
  0xf8   :  { %v2770_v8 = vpop.f32.mrb[1].mxu1  ;;  %v2749_v9 = vadd.f32 %v2748_v7, %v2747_v41  ;;  %v2750_v11 = vpop.f32.mrb[2].mxu0 }
  0xf9   :  { %v2771_v10 = vadd.f32 %v2770_v8, %v2769_v5  ;;  %v2772_v12 = vpop.f32.mrb[2].mxu1  ;;  %v2751_v13 = vpop.f32.mrb[3].mxu0 }
  0xfa   :  { %v2773_v14 = vpop.f32.mrb[3].mxu1  ;;  %v1774_v15 = vadd.f32 %v2749_v9, %v2517_v6 }
  0xfc   :  { %v1814_v16 = vadd.f32 %v2771_v10, %v1774_v15 }
 0x116   :  { %v2791_v20 = vpop.f32.mrb[4].mxu0 }
 0x117   :  { %v2813_v21 = vpop.f32.mrb[4].mxu1  ;;  %v2792_v22 = vpop.f32.mrb[5].mxu0 }
 0x118   :  { %v2814_v23 = vpop.f32.mrb[5].mxu1  ;;  %v2793_v24 = vadd.f32 %v2792_v22, %v2791_v20  ;;  %v2794_v26 = vpop.f32.mrb[6].mxu0 }
 0x119   :  { %v2815_v25 = vadd.f32 %v2814_v23, %v2813_v21  ;;  %v2816_v27 = vpop.f32.mrb[6].mxu1  ;;  %v2795_v28 = vpop.f32.mrb[7].mxu0 }
 0x11a   :  { %v2817_v29 = vpop.f32.mrb[7].mxu1  ;;  %v1854_v31 = vadd.f32 %v2793_v24, %v1814_v16  ;;  %v3270_v27 = vld [vmem:[%s4063_s5 + $0x30] sm:$0xff]   ;;  %v3271_v28 = vld [vmem:[%s4063_s5 + $0x38] sm:$0xff]  }
 0x11b   :  { %3039 = vmatpush3.bf16.msra.mxu1 %v3270_v27  ;;  %v3272_v29 = vld [vmem:[%s4065_s7] sm:$0xff]  }
 0x11c   :  { %v1894_v32 = vadd.f32 %v2815_v25, %v1854_v31  ;;  %3040 = vmatprep.subr.bf16.mxu1 %v3301_v18  ;;  %v2710_v31 = vld [vmem:[%s4062_s4] ss:$0 sm:$0xff] }
 0x11f   :  { %3041 = vmatpush3.bf16.msra.mxu1 %v3271_v28 }
 0x136   :  { %v2835_v40 = vpop.f32.mrb[8].mxu0 }
 0x137   :  { %v2857_v42 = vpop.f32.mrb[8].mxu1  ;;  %v2836_v43 = vpop.f32.mrb[9].mxu0 }
 0x138   :  { %v2858_v44 = vpop.f32.mrb[9].mxu1  ;;  %v2837_v45 = vadd.f32 %v2836_v43, %v2835_v40  ;;  %v2838_v47 = vpop.f32.mrb[10].mxu0  ;;  %v3275_v40 = vld [vmem:[%s4065_s7 + $0x18] sm:$0xff]   ;;  %s2509_s7 = sshll.u32 %s3303_s16, 4  ;;  %s2510_s7 = int_to_ptr.vmem [resolvable:$true] %s2509_s7 }
 0x139   :  { %v2859_v46 = vadd.f32 %v2858_v44, %v2857_v42  ;;  %v2860_v48 = vpop.f32.mrb[10].mxu1  ;;  %v2839_v49 = vpop.f32.mrb[11].mxu0  ;;  %v2716_v42 = vld [vmem:[%s4064_s6] ss:$0 sm:$0xff]  ;;  %s3276_s6 = scalar_lea.vmem %s2510_s7, 32  ;;  %p3281_p1 = scmp.lt.s32.totalorder %s2510_s7, %s2510_s7 }
 0x13a   :  { %v2861_v50 = vpop.f32.mrb[11].mxu1  ;;  %v1934_v51 = vadd.f32 %v2837_v45, %v1894_v32  ;;  %p3277_p0 = scmp.ne.s32.totalorder %s2510_s7, %s3276_s6  ;;  %p3282_p2 = scmp.lt.s32.totalorder %s3276_s6, %s3276_s6 }
 0x13c   :  { %v1974_v52 = vadd.f32 %v2859_v46, %v1934_v51  ;;  %p3283_p3 = por %p3282_p2, %p3281_p1 }
 0x13e   :  { %p3284_p4 = pnand %p3283_p3, %p3277_p0 }
 0x156   :  { %v2879_v53 = vpop.f32.mrb[12].mxu0 }
 0x157   :  { %v2901_v54 = vpop.f32.mrb[12].mxu1  ;;  %v2880_v55 = vpop.f32.mrb[13].mxu0 }
 0x158   :  { %v2902_v56 = vpop.f32.mrb[13].mxu1  ;;  %v2881_v57 = vadd.f32 %v2880_v55, %v2879_v53  ;;  %v2882_v59 = vpop.f32.mrb[14].mxu0 }
 0x159   :  { %v2903_v58 = vadd.f32 %v2902_v56, %v2901_v54  ;;  %v2904_v60 = vpop.f32.mrb[14].mxu1  ;;  %v2883_v61 = vpop.f32.mrb[15].mxu0 }
 0x15a   :  { %v2905_v62 = vpop.f32.mrb[15].mxu1  ;;  %v2014_v63 = vadd.f32 %v2881_v57, %v1974_v52 }
 0x15c   :  { %v2054_v0 = vadd.f32 %v2903_v58, %v2014_v63 }
 0x176   :  { %v2923_v1 = vpop.f32.mrb[16].mxu0 }
 0x177   :  { %v2945_v2 = vpop.f32.mrb[16].mxu1  ;;  %v2924_v3 = vpop.f32.mrb[17].mxu0 }
 0x178   :  { %v2946_v4 = vpop.f32.mrb[17].mxu1  ;;  %v2925_v41 = vadd.f32 %v2924_v3, %v2923_v1  ;;  %v2926_v6 = vpop.f32.mrb[18].mxu0 }
 0x179   :  { %v2947_v5 = vadd.f32 %v2946_v4, %v2945_v2  ;;  %v2948_v7 = vpop.f32.mrb[18].mxu1  ;;  %v2927_v8 = vpop.f32.mrb[19].mxu0 }
 0x17a   :  { %v2949_v9 = vpop.f32.mrb[19].mxu1  ;;  %v2094_v10 = vadd.f32 %v2925_v41, %v2054_v0 }
 0x17c   :  { %v2134_v11 = vadd.f32 %v2947_v5, %v2094_v10 }
 0x196   :  { %v2967_v12 = vpop.f32.mrb[20].mxu0 }
 0x197   :  { %v2989_v13 = vpop.f32.mrb[20].mxu1  ;;  %v2968_v14 = vpop.f32.mrb[21].mxu0 }
 0x198   :  { %v2990_v15 = vpop.f32.mrb[21].mxu1  ;;  %v2969_v16 = vadd.f32 %v2968_v14, %v2967_v12  ;;  %v2970_v19 = vpop.f32.mrb[22].mxu0 }
 0x199   :  { %v2991_v17 = vadd.f32 %v2990_v15, %v2989_v13  ;;  %v2992_v20 = vpop.f32.mrb[22].mxu1  ;;  %v2971_v21 = vpop.f32.mrb[23].mxu0 }
 0x19a   :  { %v2993_v22 = vpop.f32.mrb[23].mxu1  ;;  %v2174_v23 = vadd.f32 %v2969_v16, %v2134_v11 }
 0x19c   :  { %v2214_v24 = vadd.f32 %v2991_v17, %v2174_v23 }
 0x19e   :  { %v2219_v25 = vmax.f32 %v2214_v24, 0.0 }
 0x1a0   :  { %v2220_v26 = vpack.c.bf16 %v2219_v25, %v2219_v25 }
 0x1a2   :  { %3023 = vmatmul.mubr.msk.bf16.vlgmr.msra.gmra.mrb[24].mxu0 %vm2260_vm1, %v2220_v26 }
 0x1a3   :  { %3054 = vmatprep.mubr.msk.bf16.mxu0 %vm3302_vm0, %v3301_v18  ;;  %3047 = vmatpush3.bf16.msra.mxu0 %v3272_v29 }
 0x1a4   :  { %3048 = vmatprep.subr.bf16.mxu0 %v3301_v18 }
 0x1a7   :  { %3049 = vmatpush3.bf16.msra.mxu0 %v3273_v30 }
 0x1a8   :  { %3050 = vmatprep.subr.bf16.mxu0 %v3301_v18 }
 0x1ab   :  { %3051 = vmatpush3.bf16.msra.mxu0 %v3274_v39 }
 0x1ac   :  { %3052 = vmatprep.subr.bf16.mxu0 %v3301_v18  ;;  %v2725_v18 = vld [vmem:[%s4066_s8] ss:$0 sm:$0xff] }
 0x1af   :  { %3053 = vmatpush3.bf16.msra.mxu0 %v3275_v40 }
 0x275   :  { %v2298_v32 = vpop.f32.mrb[24].mxu0 }
 0x276   :  { %v2299_v33 = vadd.f32 %v2710_v31, %v2298_v32  ;;  %v3024_v34 = vpop.f32.mrb[25].mxu0 }
 0x277   :  { %v2301_v35 = vpop.f32.mrb[26].mxu0 }
 0x278   :  { %v2304_v36 = vmax.f32 %v2299_v33, 0.0  ;;  %v3025_v37 = vpop.f32.mrb[27].mxu0 }
 0x27a   :  { %v2305_v38 = vpack.c.bf16 %v2304_v36, %v2304_v36 }
 0x27c   :  { %3043 = vmatmul.mubr.bf16.vlgmr.msra.gmra.mrb[24].mxu1 %v2305_v38 }
 0x34f   :  { %v2411_v43 = vpop.f32.mrb[24].mxu1 }
 0x350   :  { %v2412_v44 = vadd.f32 %v2716_v42, %v2411_v43  ;;  %v3044_v45 = vpop.f32.mrb[25].mxu1 }
 0x351   :  { %v2414_v46 = vpop.f32.mrb[26].mxu1 }
 0x352   :  { %v2417_v47 = vmax.f32 %v2412_v44, 0.0  ;;  %v3045_v48 = vpop.f32.mrb[27].mxu1 }
 0x354   :  { %v2418_v49 = vpack.c.bf16 %v2417_v47, %v2417_v47 }
 0x356   :  { %3055 = vmatmul.mubr.msk.bf16.vlgmr.msra.gmra.mrb[28].mxu0 %vm2260_vm1, %v2418_v49 }
 0x429   :  { %v2495_v50 = vpop.f32.mrb[28].mxu0 }
 0x42a   :  { %v2496_v51 = vadd.f32 %v2725_v18, %v2495_v50  ;;  %v3056_v52 = vpop.f32.mrb[29].mxu0 }
 0x42b   :  { %v2498_v53 = vpop.f32.mrb[30].mxu0 }
 0x42c   :  { %v3057_v54 = vpop.f32.mrb[31].mxu0  ;;  %2502 = vst.msk [vmem:[#allocation2] sm:$0x3] %vm2501_vm2, %v2496_v51 }
 0x42d   :  { %3287 = shalt.err (!%p3284_p4)
}
 0x42e   :  { %s3288_s8 = scalar_lea.hbm %s4067_s9, 32 }
 0x42f   :  { %p3289_p5 = scmp.ne.s32.totalorder %s4067_s9, %s3288_s8  ;;  %p3292_p6 = scmp.lt.u32.totalorder %s3288_s8, %s4067_s9 }
 0x431   :  { %p3294_p7 = pnand %p3292_p6, %p3289_p5 }
 0x433   :  { %3297 = shalt.err (!%p3294_p7)
}
 0x434   :  { %2512 = dma.vmem_to_hbm [thread:$0]  %s2510_s7, 32, %s4067_s9, [#allocation3]  }
 0x435   :  { %3298 = dma.done.wait [#allocation3], 32  }
 0x436   :  { %3299 = vsyncadd [#allocation3], 4294967264 }
 0x437   :  { %2516 = vsyncpa [#allocation3], 1 }

</bundles_post_ra>
